<compile_context>
chip_gen: v7x
topology: tpu7x:2x2x1
jax: 0.10.0
libtpu: 0.0.40
codegen_flags: <defaults>
</compile_context>

<pallas_src>
import functools

import jax
import jax.numpy as jnp
from jax.experimental import pallas as pl
from jax.experimental.pallas import tpu as pltpu

IN_FEATURES = 392          # 2 * 14 * 14
K_PAD = 512                # 392 padded to 4 full lane groups
H_PAD = 128                # hidden width (50) padded to one full lane group
O_PAD = 128                # output width (2) padded to one full lane group
TILE_B = 256               # batch tile for the pipelined path (256-wide MXU on v6e/v7x)
SMALL_BATCH_MAX = 256      # at or below this many padded rows, use the single-step path


# ----------------------------------------------------------------------------
# Pallas kernels (fully fused forward passes; all intermediates stay in vregs)
# ----------------------------------------------------------------------------
def mlp_fused_kernel(x_ref, w1_ref, w2_ref, w3_ref, b_ref, o_ref):
    """o = relu(relu(x@W1 + b1) @ W2 + b2) @ W3 + b3 ; bf16 matmul in, f32 accumulate."""
    h = jnp.dot(x_ref[...], w1_ref[...], preferred_element_type=jnp.float32)
    h = jnp.maximum(h + b_ref[0:1, :], 0.0)                       # f32 bias/ReLU
    h = jnp.dot(h.astype(jnp.bfloat16), w2_ref[...], preferred_element_type=jnp.float32)
    h = jnp.maximum(h + b_ref[1:2, :], 0.0)
    o_ref[...] = (jnp.dot(h.astype(jnp.bfloat16), w3_ref[...],
                          preferred_element_type=jnp.float32) + b_ref[2:3, :])


def mlp_one_layer_kernel(x_ref, w_ref, b_ref, o_ref):
    """o = x @ W + b (fc_one_layer path)."""
    o_ref[...] = (jnp.dot(x_ref[...], w_ref[...], preferred_element_type=jnp.float32)
                  + b_ref[...])


# ----------------------------------------------------------------------------
# pallas_call wrapper
# ----------------------------------------------------------------------------
def _round_up(n, m):
    return ((n + m - 1) // m) * m


def _run(kernel, xp, consts, n_rows, flops, bytes_accessed):
    """xp: [n_rows, K_PAD] bf16 (batch already padded); consts: 2-D weight/bias operands."""
    out_shape = jax.ShapeDtypeStruct((n_rows, O_PAD), jnp.float32)
    cost = pl.CostEstimate(flops=flops, transcendentals=0, bytes_accessed=bytes_accessed)

    if n_rows <= SMALL_BATCH_MAX:
        # Tiny-batch latency path: single invocation, whole operands resident in VMEM,
        # no grid / no double-buffering machinery.
        vmem = pl.BlockSpec(memory_space=pltpu.MemorySpace.VMEM)
        return pl.pallas_call(
            kernel,
            out_shape=out_shape,
            in_specs=[vmem] * (1 + len(consts)),
            out_specs=vmem,
            cost_estimate=cost,
        )(xp, *consts)

    # Batch-tiled pipelined path: x/out tiles stream (auto double-buffered), weights
    # and bias use constant index_maps so they are DMA'd once and stay VMEM-resident.
    grid = (n_rows // TILE_B,)
    const_specs = [pl.BlockSpec(c.shape, lambda i: (0, 0)) for c in consts]  # all 2-D
    return pl.pallas_call(
        kernel,
        grid=grid,
        in_specs=[pl.BlockSpec((TILE_B, K_PAD), lambda i: (i, 0))] + const_specs,
        out_specs=pl.BlockSpec((TILE_B, O_PAD), lambda i: (i, 0)),
        out_shape=out_shape,
        compiler_params=pltpu.CompilerParams(dimension_semantics=("parallel",)),
        cost_estimate=cost,
    )(xp, *consts)


# ----------------------------------------------------------------------------
# Parameters: PyTorch-shaped raw params + one-time lane-dense bf16 packing
# ----------------------------------------------------------------------------
def init_params(key, nb_hidden_neuron=50):
    ks = jax.random.split(key, 8)
    n = lambda k, shape: jax.random.normal(k, shape, jnp.float32) * 0.1
    h = nb_hidden_neuron
    return {
        "fc_1_w": n(ks[0], (h, IN_FEATURES)),           "fc_1_b": n(ks[1], (h,)),
        "fc_2_w": n(ks[2], (h, h)),                     "fc_2_b": n(ks[3], (h,)),
        "fc_3_w": n(ks[4], (2, h)),                     "fc_3_b": n(ks[5], (2,)),
        "fc_one_layer_w": n(ks[6], (2, IN_FEATURES)),   "fc_one_layer_b": n(ks[7], (2,)),
    }


def _pad_to(a, shape):
    return jnp.pad(a, [(0, t - s) for s, t in zip(a.shape, shape)])


def pack_params(p):
    """Pre-transpose + zero-pad weights to lane-dense GEMM layout, cast to bf16 (once)."""
    h = p["fc_1_w"].shape[0]
    assert h <= H_PAD, f"nb_hidden_neuron={h} exceeds H_PAD={H_PAD}"
    assert H_PAD == O_PAD, "shared (3, 128) bias pack assumes H_PAD == O_PAD"
    bf16 = jnp.bfloat16
    w1 = _pad_to(p["fc_1_w"].T, (K_PAD, H_PAD)).astype(bf16)          # [512, 128]
    w2 = _pad_to(p["fc_2_w"].T, (H_PAD, H_PAD)).astype(bf16)          # [128, 128]
    w3 = _pad_to(p["fc_3_w"].T, (H_PAD, O_PAD)).astype(bf16)          # [128, 128]
    bias = jnp.stack([_pad_to(p["fc_1_b"], (H_PAD,)),
                      _pad_to(p["fc_2_b"], (H_PAD,)),
                      _pad_to(p["fc_3_b"], (O_PAD,))], axis=0)         # [3, 128] f32
    w_one = _pad_to(p["fc_one_layer_w"].T, (K_PAD, O_PAD)).astype(bf16)  # [512, 128]
    b_one = _pad_to(p["fc_one_layer_b"], (O_PAD,))[None, :]              # [1, 128] f32
    return {"w1": w1, "w2": w2, "w3": w3, "bias": bias,
            "w_one": w_one, "b_one": b_one}


# ----------------------------------------------------------------------------
# Forward (matches MLP.forward; nb_layer is a static Python choice as in PyTorch)
# ----------------------------------------------------------------------------
def mlp_forward(x, packed, nb_layer=1):
    b = x.shape[0]
    xf = x.reshape(b, -1)                                   # x.view(B, -1) -> [B, 392]
    assert xf.shape[1] == IN_FEATURES <= K_PAD

    # Pad batch (sublane/tile alignment) and K (lane-dense, 4x128); zero padding is
    # mathematically inert (padded W rows are zero; padded output rows are sliced off).
    n_rows = _round_up(b, 8) if b <= SMALL_BATCH_MAX else _round_up(b, TILE_B)
    xp = jnp.pad(xf, ((0, n_rows - b), (0, K_PAD - IN_FEATURES))).astype(jnp.bfloat16)

    if nb_layer == 1:
        consts = (packed["w_one"], packed["b_one"])
        flops = 2 * n_rows * K_PAD * O_PAD
        bytes_acc = (n_rows * K_PAD * 2 + K_PAD * O_PAD * 2
                     + O_PAD * 4 + n_rows * O_PAD * 4)
        out = _run(mlp_one_layer_kernel, xp, consts, n_rows, flops, bytes_acc)
    else:
        consts = (packed["w1"], packed["w2"], packed["w3"], packed["bias"])
        flops = 2 * n_rows * (K_PAD * H_PAD + H_PAD * H_PAD + H_PAD * O_PAD)
        bytes_acc = (n_rows * K_PAD * 2
                     + (K_PAD * H_PAD + H_PAD * H_PAD + H_PAD * O_PAD) * 2
                     + 3 * H_PAD * 4 + n_rows * O_PAD * 4)
        out = _run(mlp_fused_kernel, xp, consts, n_rows, flops, bytes_acc)
    return out[:b, :2]                                      # drop batch/lane padding -> [B, 2]


# ----------------------------------------------------------------------------
# Pure-JAX reference with the same bf16-input / f32-accumulate numerics
# ----------------------------------------------------------------------------
def ref_forward(x, raw, nb_layer):
    hp = jax.lax.Precision.HIGHEST
    r = lambda a: a.astype(jnp.bfloat16).astype(jnp.float32)
    xf = r(x.reshape(x.shape[0], -1))
    if nb_layer == 1:
        return jnp.dot(xf, r(raw["fc_one_layer_w"]).T, precision=hp) + raw["fc_one_layer_b"]
    h = jnp.maximum(jnp.dot(xf, r(raw["fc_1_w"]).T, precision=hp) + raw["fc_1_b"], 0.0)
    h = jnp.maximum(jnp.dot(r(h), r(raw["fc_2_w"]).T, precision=hp) + raw["fc_2_b"], 0.0)
    return jnp.dot(r(h), r(raw["fc_3_w"]).T, precision=hp) + raw["fc_3_b"]


if __name__ == "__main__":
    key = jax.random.PRNGKey(0)
    kx, kp, kb = jax.random.split(key, 3)
    raw = init_params(kp)
    packed = pack_params(raw)

    fwd_one = jax.jit(functools.partial(mlp_forward, nb_layer=1))   # default module config
    fwd_mlp = jax.jit(functools.partial(mlp_forward, nb_layer=3))   # multi-layer path

    # Tiny-batch latency path (single-step, no-pipeline VMEM specs).
    x_small = jax.random.normal(kx, (2, 2, 14, 14), jnp.float32)    # -> 392 features
    y_one = fwd_one(x_small, packed)
    y_mlp = fwd_mlp(x_small, packed)

    # Batch-tiled pipelined path (non-multiple of TILE_B to exercise tail padding).
    x_big = jax.random.normal(kb, (384, 2, 14, 14), jnp.float32)
    y_big = fwd_mlp(x_big, packed)

    jax.block_until_ready((y_one, y_mlp, y_big))

    assert y_one.shape == (2, 2) and y_one.dtype == jnp.float32
    assert y_mlp.shape == (2, 2) and y_mlp.dtype == jnp.float32
    assert y_big.shape == (384, 2) and y_big.dtype == jnp.float32

    for got, x_in, nl in ((y_one, x_small, 1), (y_mlp, x_small, 3), (y_big, x_big, 3)):
        want = ref_forward(x_in, raw, nl)
        err = float(jnp.max(jnp.abs(got - want)))
        assert jnp.allclose(got, want, atol=2e-3, rtol=2e-3), f"max abs err {err}"

    print("KERNEL_OK")
</pallas_src>

<mosaic_0001>
module attributes {stable_mosaic.version = 11 : i64} {
  func.func @mlp_one_layer_kernel(%arg0: memref<8x512xbf16, #tpu.memory_space<vmem>>, %arg1: memref<512x128xbf16, #tpu.memory_space<vmem>>, %arg2: memref<1x128xf32, #tpu.memory_space<vmem>>, %arg3: memref<8x128xf32, #tpu.memory_space<vmem>>) attributes {dimension_semantics = [], scalar_prefetch = 0 : i64, scratch_operands = 0 : i64, tpu.core_type = #tpu.core_type<tc>} {
    %c0 = arith.constant 0 : index
    %c0_0 = arith.constant 0 : index
    %0 = vector.load %arg0[%c0, %c0_0] : memref<8x512xbf16, #tpu.memory_space<vmem>>, vector<8x512xbf16>
    %c0_1 = arith.constant 0 : index
    %c0_2 = arith.constant 0 : index
    %1 = vector.load %arg1[%c0_1, %c0_2] : memref<512x128xbf16, #tpu.memory_space<vmem>>, vector<512x128xbf16>
    %cst = arith.constant dense<0.000000e+00> : vector<8x128xf32>
    %2 = tpu.matmul %0, %1, %cst {dimension_numbers = #tpu.dot_dimension_numbers<[1], [0], [0], [1], [0, 0, 1, 1], [], []>} : vector<8x512xbf16>, vector<512x128xbf16>, vector<8x128xf32> -> vector<8x128xf32>
    %c0_3 = arith.constant 0 : index
    %c0_4 = arith.constant 0 : index
    %3 = vector.load %arg2[%c0_3, %c0_4] : memref<1x128xf32, #tpu.memory_space<vmem>>, vector<1x128xf32>
    %4 = vector.broadcast %3 : vector<1x128xf32> to vector<8x128xf32>
    %5 = arith.addf %2, %4 : vector<8x128xf32>
    %c0_5 = arith.constant 0 : index
    %c0_6 = arith.constant 0 : index
    %6 = vector.load %arg3[%c0_5, %c0_6] : memref<8x128xf32, #tpu.memory_space<vmem>>, vector<8x128xf32>
    tpu.vector_store %arg3[%c0_5, %c0_6], %5 {strides = array<i32>} : memref<8x128xf32, #tpu.memory_space<vmem>>, vector<8x128xf32>,
    return
  }
}

</mosaic_0001>

<bundles_post_ra>
// kernel: mlp_forward.1
= control target key start
LH: loop header
LB: loop body
LE: loop exit
PB: predicated region body
PF: predicated region fallthrough
CT: control target
= control target key end

     0   :  { %8 = vsyncpa [#allocation3], 0  ;;  %s538_s12 = smov [#allocation2]   ;;  %s585_s0 = inlined_call_operand.vmem [shape: bf16[8,512], index: 0, kind: input, shape index: {}]   ;;  %s586_s1 = inlined_call_operand.hbm [shape: bf16[512,128], index: 1, kind: input, shape index: {}]   ;;  %s587_s2 = inlined_call_operand.vmem [shape: f32[1,128], index: 2, kind: input, shape index: {}]   ;;  %s588_s3 = inlined_call_operand.vmem [shape: f32[8,128], index: 3, kind: output, shape index: {}]  }
   0x1   :  { %s16_s13 = sshll.u32 %s538_s12, 4  ;;  %s514_s16 = scalar_lea.hbm %s586_s1, 4096  ;;  %s17_s13 = int_to_ptr.vmem [resolvable:$true] %s16_s13 }
   0x2   :  { %p515_p0 = scmp.ne.s32.totalorder %s586_s1, %s514_s16  ;;  %p518_p1 = scmp.lt.u32.totalorder %s514_s16, %s586_s1 }
   0x4   :  { %p520_p2 = pnand %p518_p1, %p515_p0 }
   0x6   :  { %523 = shalt.err (!%p520_p2)
}
   0x7   :  { %s524_s21 = scalar_lea.vmem %s17_s13, 4096  ;;  %p529_p4 = scmp.lt.s32.totalorder %s17_s13, %s17_s13 }
   0x8   :  { %p525_p3 = scmp.ne.s32.totalorder %s17_s13, %s524_s21  ;;  %p530_p5 = scmp.lt.s32.totalorder %s524_s21, %s524_s21 }
   0xa   :  { %p531_p6 = por %p530_p5, %p529_p4 }
   0xc   :  { %p532_p7 = pnand %p531_p6, %p525_p3 }
   0xe   :  { %535 = shalt.err (!%p532_p7)
}
   0xf   :  { %s539_s22 = smov 64   ;;  %s540_s23 = smov 4  }
  0x10   :  { %22 = dma.hbm_to_vmem [thread:$0]  %s586_s1, 4096, %s17_s13, [#allocation3], %s539_s22, %s539_s22, %s540_s23  }
  0x11   :  { %536 = dma.done.wait [#allocation3], 4096  }
  0x12   :  { %537 = vsyncadd [#allocation3], 4294963200  ;;  %v478_v0 = vld [vmem:[#allocation2 + $0x40] sm:$0xff]   ;;  %v482_v4 = vld [vmem:[#allocation2 + $0x48] sm:$0xff]  }
  0x13   :  { %v479_v1 = vld [vmem:[#allocation2 + $0xc0] sm:$0xff]   ;;  %431 = vmatprep.subr.bf16.mxu0 %v478_v0  ;;  %v483_v5 = vld [vmem:[#allocation2 + $0xc8] sm:$0xff]   ;;  %v486_v8 = vld [vmem:[#allocation2 + $0x50] sm:$0xff]  }
  0x14   :  { %v480_v2 = vld [vmem:[#allocation2] sm:$0xff]   ;;  %453 = vmatprep.subr.bf16.mxu1 %v479_v1  ;;  %v484_v6 = vld [vmem:[#allocation2 + $0x8] sm:$0xff]   ;;  %v487_v9 = vld [vmem:[#allocation2 + $0xd0] sm:$0xff]  }
  0x15   :  { %v481_v3 = vld [vmem:[#allocation2 + $0x80] sm:$0xff]   ;;  %432 = vmatpush3.bf16.msra.mxu0 %v480_v2  ;;  %v485_v7 = vld [vmem:[#allocation2 + $0x88] sm:$0xff]   ;;  %v488_v10 = vld [vmem:[#allocation2 + $0x10] sm:$0xff]  }
  0x16   :  { %454 = vmatpush3.bf16.msra.mxu1 %v481_v3  ;;  %433 = vmatprep.subr.bf16.mxu0 %v482_v4  ;;  %v489_v11 = vld [vmem:[#allocation2 + $0x90] sm:$0xff]   ;;  %v490_v12 = vld [vmem:[#allocation2 + $0x58] sm:$0xff]   ;;  %v494_v16 = vld [vmem:[#allocation2 + $0x60] sm:$0xff]  }
  0x17   :  { %455 = vmatprep.subr.bf16.mxu1 %v483_v5  ;;  %v491_v13 = vld [vmem:[#allocation2 + $0xd8] sm:$0xff]   ;;  %v495_v17 = vld [vmem:[#allocation2 + $0xe0] sm:$0xff]   ;;  %v498_v20 = vld [vmem:[#allocation2 + $0x68] sm:$0xff]  }
  0x18   :  { %v492_v14 = vld [vmem:[#allocation2 + $0x18] sm:$0xff]   ;;  %v496_v18 = vld [vmem:[#allocation2 + $0x20] sm:$0xff]   ;;  %v499_v21 = vld [vmem:[#allocation2 + $0xe8] sm:$0xff]  }
  0x19   :  { %434 = vmatpush3.bf16.msra.mxu0 %v484_v6  ;;  %v493_v15 = vld [vmem:[#allocation2 + $0x98] sm:$0xff]   ;;  %v497_v19 = vld [vmem:[#allocation2 + $0xa0] sm:$0xff]   ;;  %v500_v22 = vld [vmem:[#allocation2 + $0x28] sm:$0xff]  }
  0x1a   :  { %456 = vmatpush3.bf16.msra.mxu1 %v485_v7  ;;  %435 = vmatprep.subr.bf16.mxu0 %v486_v8  ;;  %v501_v23 = vld [vmem:[#allocation2 + $0xa8] sm:$0xff]   ;;  %v502_v24 = vld [vmem:[#allocation2 + $0x70] sm:$0xff]   ;;  %v506_v28 = vld [vmem:[#allocation2 + $0x78] sm:$0xff]  }
  0x1b   :  { %457 = vmatprep.subr.bf16.mxu1 %v487_v9  ;;  %v503_v25 = vld [vmem:[#allocation2 + $0xf0] sm:$0xff]   ;;  %v507_v29 = vld [vmem:[#allocation2 + $0xf8] sm:$0xff]   ;;  %v29_v32 = vld [vmem:[%s585_s0] sm:$0xff] }
  0x1c   :  { %v504_v26 = vld [vmem:[#allocation2 + $0x30] sm:$0xff]   ;;  %v508_v30 = vld [vmem:[#allocation2 + $0x38] sm:$0xff]   ;;  %v30_v33 = vld [vmem:[%s585_s0 + $0x8] sm:$0xff]  ;;  %v395_v34 = vcombine.low %v29_v32, %v29_v32  ;;  %v396_v35 = vcombine.high %v29_v32, %v29_v32 }
  0x1d   :  { %436 = vmatpush3.bf16.msra.mxu0 %v488_v10  ;;  %v505_v27 = vld [vmem:[#allocation2 + $0xb0] sm:$0xff]   ;;  %v509_v31 = vld [vmem:[#allocation2 + $0xb8] sm:$0xff]   ;;  %v397_v36 = vcombine.low %v30_v33, %v30_v33  ;;  %v398_v37 = vcombine.high %v30_v33, %v30_v33  ;;  %v394_v40 = vld [vmem:[%s587_s2] ss:$0 sm:$0xff] }
  0x1e   :  { %458 = vmatpush3.bf16.msra.mxu1 %v489_v11  ;;  %437 = vmatprep.subr.bf16.mxu0 %v490_v12 }
  0x1f   :  { %459 = vmatprep.subr.bf16.mxu1 %v491_v13  ;;  %340 = vmatprep.mubr.bf16.mxu0 %v396_v35 }
  0x20   :  { %380 = vmatprep.mubr.bf16.mxu1 %v398_v37 }
  0x21   :  { %438 = vmatpush3.bf16.msra.mxu0 %v492_v14 }
  0x22   :  { %460 = vmatpush3.bf16.msra.mxu1 %v493_v15  ;;  %439 = vmatprep.subr.bf16.mxu0 %v494_v16 }
  0x23   :  { %461 = vmatprep.subr.bf16.mxu1 %v495_v17 }
  0x25   :  { %440 = vmatpush3.bf16.msra.mxu0 %v496_v18 }
  0x26   :  { %462 = vmatpush3.bf16.msra.mxu1 %v497_v19  ;;  %441 = vmatprep.subr.bf16.mxu0 %v498_v20 }
  0x27   :  { %463 = vmatprep.subr.bf16.mxu1 %v499_v21 }
  0x29   :  { %442 = vmatpush3.bf16.msra.mxu0 %v500_v22 }
  0x2a   :  { %464 = vmatpush3.bf16.msra.mxu1 %v501_v23  ;;  %443 = vmatprep.subr.bf16.mxu0 %v502_v24 }
  0x2b   :  { %465 = vmatprep.subr.bf16.mxu1 %v503_v25 }
  0x2d   :  { %444 = vmatpush3.bf16.msra.mxu0 %v504_v26 }
  0x2e   :  { %466 = vmatpush3.bf16.msra.mxu1 %v505_v27  ;;  %445 = vmatprep.subr.bf16.mxu0 %v506_v28 }
  0x2f   :  { %467 = vmatprep.subr.bf16.mxu1 %v507_v29 }
  0x31   :  { %446 = vmatpush3.bf16.msra.mxu0 %v508_v30 }
  0x32   :  { %468 = vmatpush3.bf16.msra.mxu1 %v509_v31 }
  0x34   :  { %341 = vmatmul.mubr.bf16.vlgmr.msra.gmra.mrb[0].mxu0 %v395_v34 }
  0x35   :  { %381 = vmatmul.mubr.bf16.vlgmr.msra.gmra.mrb[0].mxu1 %v397_v36 }
 0x107   :  { %v447_v38 = vpop.f32.mrb[0].mxu0 }
 0x108   :  { %v469_v39 = vpop.f32.mrb[0].mxu1  ;;  %v448_v41 = vpop.f32.mrb[1].mxu0 }
 0x109   :  { %v470_v42 = vpop.f32.mrb[1].mxu1  ;;  %v449_v43 = vadd.f32 %v448_v41, %v447_v38  ;;  %v450_v45 = vpop.f32.mrb[2].mxu0 }
 0x10a   :  { %v471_v44 = vadd.f32 %v470_v42, %v469_v39  ;;  %v472_v46 = vpop.f32.mrb[2].mxu1  ;;  %v451_v47 = vpop.f32.mrb[3].mxu0 }
 0x10b   :  { %v473_v48 = vpop.f32.mrb[3].mxu1  ;;  %v343_v49 = vadd.f32 %v449_v43, %v394_v40 }
 0x10d   :  { %v383_v50 = vadd.f32 %v471_v44, %v343_v49 }
 0x10f   :  { %388 = vst [vmem:[%s588_s3] sm:$0xff] %v383_v50 }
 0x110   :  { %393 = vsyncpa [#allocation3], 1 }

</bundles_post_ra>
